<compile_context>
chip_gen: v7x
topology: tpu7x:2x2x1
jax: 0.10.0
libtpu: 0.0.40
codegen_flags: <defaults>
</compile_context>

<pallas_src>
import functools

import jax
import jax.numpy as jnp
from jax.experimental import pallas as pl
from jax.experimental.pallas import tpu as pltpu

LANE = 128


def _swish(x):
    return x * jax.nn.sigmoid(x)


def _npg_packed_kernel(x_ref, w0_ref, w12_ref, w3_ref, b_ref, o_ref, *, matmul_dtype):
    """One grid step = one batch tile; whole lane-packed ensemble per matmul."""
    EH = w0_ref.shape[1]
    P3 = w3_ref.shape[1]

    def cast(a):
        return a.astype(matmul_dtype)

    def mm(a, w):
        # f32 accumulation always; operands optionally narrowed (bf16 on v6e/v7x).
        return jnp.dot(cast(a), cast(w), preferred_element_type=jnp.float32)

    b = b_ref[...]                                   # (4, max(EH, P3)) bias slab
    x = x_ref[...]                                   # (TB, E*Din), normalization folded

    h = _swish(mm(x, w0_ref[...]) + b[0:1, :EH])     # (TB, E*H)
    h = _swish(mm(h, w12_ref[0]) + b[1:2, :EH])      # (TB, E*H)
    h = _swish(mm(h, w12_ref[1]) + b[2:3, :EH])      # (TB, E*H)
    out = mm(h, w3_ref[...]) + b[3:4, :P3]           # (TB, P3)  lane-dense
    o_ref[...] = out.astype(o_ref.dtype)


def prepare_npg_params(mu, sigma, weights, biases, *, matmul_dtype=jnp.float32):
    """One-time parameter packing (hoisted off the per-inference hot path)."""
    E, Din, H = weights[0].shape
    Dout = weights[3].shape[-1]
    EH, EDin, EDout = E * H, E * Din, E * Dout
    P3 = ((EDout + LANE - 1) // LANE) * LANE
    Wb = max(EH, P3)

    # Fold (x - mu) / sigma into layer 0 (exact up to one extra f32 rounding).
    inv_sigma = 1.0 / sigma                                         # (1, Din)
    w0_fold = weights[0] * inv_sigma[0][None, :, None]              # (E, Din, H)
    b0_fold = biases[0] + jnp.einsum('od,edh->eoh', -mu * inv_sigma, weights[0])

    def block_diag(w):                                              # (E, di, do) -> (E*di, E*do)
        e, di, do = w.shape
        out = jnp.zeros((e * di, e * do), w.dtype)
        for i in range(e):
            out = out.at[i * di:(i + 1) * di, i * do:(i + 1) * do].set(w[i])
        return out

    w0_blk = block_diag(w0_fold)                                    # (E*Din, E*H)
    w12_blk = jnp.stack([block_diag(weights[1]), block_diag(weights[2])])   # (2, E*H, E*H)
    w3_blk = jnp.pad(block_diag(weights[3]), ((0, 0), (0, P3 - EDout)))     # (E*H, P3)

    def pack_bias(b):                                               # (E, 1, D) -> (1, Wb)
        flat = b.reshape(1, -1)                                     # member-major along lanes
        return jnp.pad(flat, ((0, 0), (0, Wb - flat.shape[1])))

    b_all = jnp.concatenate(
        [pack_bias(b0_fold), pack_bias(biases[1]),
         pack_bias(biases[2]), pack_bias(biases[3])], axis=0)       # (4, Wb)

    mmdt = jnp.dtype(matmul_dtype)
    if mmdt != jnp.float32:
        # Store weights narrow in HBM: halves weight DMA bytes, feeds the v6e/v7x
        # bf16 MXU path directly (accumulation stays f32 inside the kernel).
        w0_blk, w12_blk, w3_blk = (a.astype(mmdt) for a in (w0_blk, w12_blk, w3_blk))

    packed = (w0_blk, w12_blk, w3_blk, b_all)
    meta = dict(E=E, Din=Din, H=H, Dout=Dout, P3=P3, matmul_dtype=mmdt)
    return packed, meta


def npg_forward_pallas(states, actions, packed, meta, *, batch_tile=None):
    """states: (E, B, Ds) (already state_preproc'ed), actions: (E, B, Da)."""
    E, Din, H, Dout, P3 = meta['E'], meta['Din'], meta['H'], meta['Dout'], meta['P3']
    matmul_dtype = meta['matmul_dtype']
    w0_blk, w12_blk, w3_blk, b_all = packed

    Eb, B, Ds = states.shape
    Da = actions.shape[-1]
    assert Eb == E and Ds + Da == Din
    EDin = E * Din

    # Lane-pack the activations: (E, B, Din) member-major -> (B, E*Din).
    # Tiny fused XLA ops; replaces E per-member kernel matmuls / broadcasts.
    comb = jnp.concatenate([states, actions], axis=-1)              # (E, B, Din)
    x = jnp.transpose(comb, (1, 0, 2)).reshape(B, EDin)             # (B, E*Din)

    TB = B if batch_tile is None else batch_tile                    # sublane-mult of 8
    grid = (pl.cdiv(B, TB),)

    def const_spec(shape):
        return pl.BlockSpec(shape, lambda i, _nd=len(shape): (0,) * _nd)

    out = pl.pallas_call(
        functools.partial(_npg_packed_kernel, matmul_dtype=matmul_dtype),
        out_shape=jax.ShapeDtypeStruct((B, P3), jnp.float32),
        grid_spec=pltpu.PrefetchScalarGridSpec(
            num_scalar_prefetch=0,
            grid=grid,
            in_specs=[
                pl.BlockSpec((TB, EDin), lambda i: (i, 0)),         # activations: B-tiled
                const_spec(w0_blk.shape),                           # weights: VMEM-resident
                const_spec(w12_blk.shape),
                const_spec(w3_blk.shape),
                const_spec(b_all.shape),
            ],
            out_specs=pl.BlockSpec((TB, P3), lambda i: (i, 0)),
        ),
        compiler_params=pltpu.CompilerParams(
            # B-tile axis is independent -> shards across v7x's 2 TCs at production B.
            dimension_semantics=("parallel",)),
    )(x, w0_blk, w12_blk, w3_blk, b_all)

    # Unpack the lane-packed output: (B, P3) -> (E, B, Dout).
    out = out[:, :E * Dout].reshape(B, E, Dout)
    return jnp.transpose(out, (1, 0, 2))


def npg_forward_reference(states, actions, mu, sigma, weights, biases):
    comb = jnp.concatenate([states, actions], axis=-1)
    comb = (comb - mu[None]) / sigma[None]
    acts = [_swish, _swish, _swish, lambda v: v]
    for w, b, a in zip(weights, biases, acts):
        comb = a(jnp.einsum('ebi,eio->ebo', comb, w) + b)
    return comb


def init_params(key, ensemble_size, input_size, hidden_size, output_size):
    """Deterministic truncated-normal init mirroring trunc_initializer()."""
    import numpy as np
    ks = jax.random.split(key, 4)
    dims = [(input_size, hidden_size), (hidden_size, hidden_size),
            (hidden_size, hidden_size), (hidden_size, output_size)]
    stds = [1.0 / (2.0 * np.sqrt(input_size))] + \
           [1.0 / (2.0 * np.sqrt(hidden_size))] * 3
    weights, biases = [], []
    for k, (din, dout), std in zip(ks, dims, stds):
        w = jax.random.truncated_normal(
            k, -2.0, 2.0, (ensemble_size, din, dout), jnp.float32) * std
        weights.append(w)
        biases.append(jnp.zeros((ensemble_size, 1, dout), jnp.float32))
    return weights, biases


if __name__ == "__main__":
    import numpy as np

    # Small shapes consistent with the module's forward.
    ensemble_size = 4
    state_size = 12
    action_size = 4
    input_size = state_size + action_size   # 16
    hidden_size = 32                         # E*H = 128 -> exactly one lane tile
    output_size = 12
    batch = 8

    key = jax.random.PRNGKey(0)
    k_states, k_actions, k_params, k_mu, k_sigma = jax.random.split(key, 5)

    states = jax.random.normal(k_states, (ensemble_size, batch, state_size), jnp.float32)
    actions = jax.random.normal(k_actions, (ensemble_size, batch, action_size), jnp.float32)

    # TODO(synk): env_spec.state_preproc is environment-specific; identity used here.
    states_proc = states

    weights, biases = init_params(k_params, ensemble_size, input_size,
                                  hidden_size, output_size)
    mu = 0.1 * jax.random.normal(k_mu, (1, input_size), jnp.float32)
    sigma = 1.0 + 0.5 * jax.random.uniform(k_sigma, (1, input_size), jnp.float32)

    # One-time parameter prep (off the hot path); f32 keeps the 1e-5 check exact.
    packed, meta = prepare_npg_params(mu, sigma, weights, biases,
                                      matmul_dtype=jnp.float32)

    forward = jax.jit(functools.partial(npg_forward_pallas, packed=packed, meta=meta))
    out = jax.block_until_ready(forward(states_proc, actions))

    ref = npg_forward_reference(states_proc, actions, mu, sigma, weights, biases)
    np.testing.assert_allclose(np.asarray(out), np.asarray(ref), rtol=1e-5, atol=1e-5)

    print("KERNEL_OK")
</pallas_src>

<mosaic_0001>
module attributes {stable_mosaic.version = 11 : i64} {
  func.func @_npg_packed_kernel(%arg0: i32, %arg1: memref<8x64xf32, #tpu.memory_space<vmem>>, %arg2: memref<64x128xf32, #tpu.memory_space<vmem>>, %arg3: memref<2x128x128xf32, #tpu.memory_space<vmem>>, %arg4: memref<128x128xf32, #tpu.memory_space<vmem>>, %arg5: memref<4x128xf32, #tpu.memory_space<vmem>>, %arg6: memref<8x128xf32, #tpu.memory_space<vmem>>) attributes {dimension_semantics = [#tpu.dimension_semantics<parallel>], iteration_bounds = array<i64: 1>, scalar_prefetch = 0 : i64, scratch_operands = 0 : i64, tpu.core_type = #tpu.core_type<tc>, window_params = [{transform_indices = @transform_0, window_bounds = array<i64: 8, 64>}, {pipeline_mode = #tpu.pipeline_mode<synchronous>, transform_indices = @transform_1, window_bounds = array<i64: 64, 128>}, {pipeline_mode = #tpu.pipeline_mode<synchronous>, transform_indices = @transform_2, window_bounds = array<i64: 2, 128, 128>}, {pipeline_mode = #tpu.pipeline_mode<synchronous>, transform_indices = @transform_3, window_bounds = array<i64: 128, 128>}, {pipeline_mode = #tpu.pipeline_mode<synchronous>, transform_indices = @transform_4, window_bounds = array<i64: 4, 128>}, {transform_indices = @transform_5, window_bounds = array<i64: 8, 128>}]} {
    %c0 = arith.constant 0 : index
    %c0_0 = arith.constant 0 : index
    %0 = vector.load %arg5[%c0, %c0_0] : memref<4x128xf32, #tpu.memory_space<vmem>>, vector<4x128xf32>
    %c0_1 = arith.constant 0 : index
    %c0_2 = arith.constant 0 : index
    %1 = vector.load %arg1[%c0_1, %c0_2] : memref<8x64xf32, #tpu.memory_space<vmem>>, vector<8x64xf32>
    %c0_3 = arith.constant 0 : index
    %c0_4 = arith.constant 0 : index
    %2 = vector.load %arg2[%c0_3, %c0_4] : memref<64x128xf32, #tpu.memory_space<vmem>>, vector<64x128xf32>
    %cst = arith.constant dense<0.000000e+00> : vector<8x128xf32>
    %3 = tpu.matmul %1, %2, %cst {dimension_numbers = #tpu.dot_dimension_numbers<[1], [0], [0], [1], [0, 0, 1, 1], [], []>} : vector<8x64xf32>, vector<64x128xf32>, vector<8x128xf32> -> vector<8x128xf32>
    %4 = vector.extract_strided_slice %0 {offsets = [0, 0], sizes = [1, 128], strides = [1, 1]} : vector<4x128xf32> to vector<1x128xf32>
    %5 = vector.broadcast %4 : vector<1x128xf32> to vector<8x128xf32>
    %6 = arith.addf %3, %5 : vector<8x128xf32>
    %7 = arith.negf %6 : vector<8x128xf32>
    %8 = math.exp %7 : vector<8x128xf32>
    %cst_5 = arith.constant 1.000000e+00 : f32
    %9 = vector.broadcast %cst_5 : f32 to vector<8x128xf32>
    %10 = arith.addf %9, %8 : vector<8x128xf32>
    %11 = arith.divf %9, %10 : vector<8x128xf32>
    %12 = arith.mulf %6, %11 : vector<8x128xf32>
    %c0_6 = arith.constant 0 : index
    %c0_7 = arith.constant 0 : index
    %c0_8 = arith.constant 0 : index
    %13 = vector.load %arg3[%c0_6, %c0_7, %c0_8] : memref<2x128x128xf32, #tpu.memory_space<vmem>>, vector<1x128x128xf32>
    %14 = vector.shape_cast %13 : vector<1x128x128xf32> to vector<128x128xf32>
    %cst_9 = arith.constant dense<0.000000e+00> : vector<8x128xf32>
    %15 = tpu.matmul %12, %14, %cst_9 {dimension_numbers = #tpu.dot_dimension_numbers<[1], [0], [0], [1], [0, 0, 1, 1], [], []>} : vector<8x128xf32>, vector<128x128xf32>, vector<8x128xf32> -> vector<8x128xf32>
    %16 = vector.extract_strided_slice %0 {offsets = [1, 0], sizes = [1, 128], strides = [1, 1]} : vector<4x128xf32> to vector<1x128xf32>
    %17 = vector.broadcast %16 : vector<1x128xf32> to vector<8x128xf32>
    %18 = arith.addf %15, %17 : vector<8x128xf32>
    %19 = arith.negf %18 : vector<8x128xf32>
    %20 = math.exp %19 : vector<8x128xf32>
    %cst_10 = arith.constant 1.000000e+00 : f32
    %21 = vector.broadcast %cst_10 : f32 to vector<8x128xf32>
    %22 = arith.addf %21, %20 : vector<8x128xf32>
    %23 = arith.divf %21, %22 : vector<8x128xf32>
    %24 = arith.mulf %18, %23 : vector<8x128xf32>
    %c1 = arith.constant 1 : index
    %c0_11 = arith.constant 0 : index
    %c0_12 = arith.constant 0 : index
    %25 = vector.load %arg3[%c1, %c0_11, %c0_12] : memref<2x128x128xf32, #tpu.memory_space<vmem>>, vector<1x128x128xf32>
    %26 = vector.shape_cast %25 : vector<1x128x128xf32> to vector<128x128xf32>
    %cst_13 = arith.constant dense<0.000000e+00> : vector<8x128xf32>
    %27 = tpu.matmul %24, %26, %cst_13 {dimension_numbers = #tpu.dot_dimension_numbers<[1], [0], [0], [1], [0, 0, 1, 1], [], []>} : vector<8x128xf32>, vector<128x128xf32>, vector<8x128xf32> -> vector<8x128xf32>
    %28 = vector.extract_strided_slice %0 {offsets = [2, 0], sizes = [1, 128], strides = [1, 1]} : vector<4x128xf32> to vector<1x128xf32>
    %29 = vector.broadcast %28 : vector<1x128xf32> to vector<8x128xf32>
    %30 = arith.addf %27, %29 : vector<8x128xf32>
    %31 = arith.negf %30 : vector<8x128xf32>
    %32 = math.exp %31 : vector<8x128xf32>
    %cst_14 = arith.constant 1.000000e+00 : f32
    %33 = vector.broadcast %cst_14 : f32 to vector<8x128xf32>
    %34 = arith.addf %33, %32 : vector<8x128xf32>
    %35 = arith.divf %33, %34 : vector<8x128xf32>
    %36 = arith.mulf %30, %35 : vector<8x128xf32>
    %c0_15 = arith.constant 0 : index
    %c0_16 = arith.constant 0 : index
    %37 = vector.load %arg4[%c0_15, %c0_16] : memref<128x128xf32, #tpu.memory_space<vmem>>, vector<128x128xf32>
    %cst_17 = arith.constant dense<0.000000e+00> : vector<8x128xf32>
    %38 = tpu.matmul %36, %37, %cst_17 {dimension_numbers = #tpu.dot_dimension_numbers<[1], [0], [0], [1], [0, 0, 1, 1], [], []>} : vector<8x128xf32>, vector<128x128xf32>, vector<8x128xf32> -> vector<8x128xf32>
    %39 = vector.extract_strided_slice %0 {offsets = [3, 0], sizes = [1, 128], strides = [1, 1]} : vector<4x128xf32> to vector<1x128xf32>
    %40 = vector.broadcast %39 : vector<1x128xf32> to vector<8x128xf32>
    %41 = arith.addf %38, %40 : vector<8x128xf32>
    %c0_18 = arith.constant 0 : index
    %c0_19 = arith.constant 0 : index
    %42 = vector.load %arg6[%c0_18, %c0_19] : memref<8x128xf32, #tpu.memory_space<vmem>>, vector<8x128xf32>
    tpu.vector_store %arg6[%c0_18, %c0_19], %41 {strides = array<i32>} : memref<8x128xf32, #tpu.memory_space<vmem>>, vector<8x128xf32>,
    return
  }
  func.func @transform_0(%arg0: i32) -> (i32, i32) {
    %c0_i32 = arith.constant 0 : i32
    %c0_i32_0 = arith.constant 0 : i32
    return %arg0, %c0_i32 : i32, i32
  }
  func.func @transform_1(%arg0: i32) -> (i32, i32) {
    %c0_i32 = arith.constant 0 : i32
    %c0_i32_0 = arith.constant 0 : i32
    %c0_i32_1 = arith.constant 0 : i32
    return %c0_i32, %c0_i32_0 : i32, i32
  }
  func.func @transform_2(%arg0: i32) -> (i32, i32, i32) {
    %c0_i32 = arith.constant 0 : i32
    %c0_i32_0 = arith.constant 0 : i32
    %c0_i32_1 = arith.constant 0 : i32
    %c0_i32_2 = arith.constant 0 : i32
    return %c0_i32, %c0_i32_0, %c0_i32_1 : i32, i32, i32
  }
  func.func @transform_3(%arg0: i32) -> (i32, i32) {
    %c0_i32 = arith.constant 0 : i32
    %c0_i32_0 = arith.constant 0 : i32
    %c0_i32_1 = arith.constant 0 : i32
    return %c0_i32, %c0_i32_0 : i32, i32
  }
  func.func @transform_4(%arg0: i32) -> (i32, i32) {
    %c0_i32 = arith.constant 0 : i32
    %c0_i32_0 = arith.constant 0 : i32
    %c0_i32_1 = arith.constant 0 : i32
    return %c0_i32, %c0_i32_0 : i32, i32
  }
  func.func @transform_5(%arg0: i32) -> (i32, i32) {
    %c0_i32 = arith.constant 0 : i32
    %c0_i32_0 = arith.constant 0 : i32
    return %arg0, %c0_i32 : i32, i32
  }
}

</mosaic_0001>

<bundles_post_ra>
// kernel: npg_forward_pallas.1
= control target key start
LH: loop header
LB: loop body
LE: loop exit
PB: predicated region body
PF: predicated region fallthrough
CT: control target
= control target key end

     0   :  { %10 = vsyncpa [#allocation3], 0  ;;  %s1004_s0 = inlined_call_operand.vmem [shape: f32[8,64], index: 0, kind: input, shape index: {}]   ;;  %s1005_s1 = inlined_call_operand.hbm [shape: f32[64,128], index: 1, kind: input, shape index: {}]   ;;  %s1006_s2 = inlined_call_operand.vmem [shape: f32[2,128,128], index: 2, kind: input, shape index: {}]   ;;  %s1007_s3 = inlined_call_operand.hbm [shape: f32[128,128], index: 3, kind: input, shape index: {}]   ;;  %s1008_s4 = inlined_call_operand.vmem [shape: f32[4,128], index: 4, kind: input, shape index: {}]   ;;  %s1009_s5 = inlined_call_operand.vmem [shape: f32[8,128], index: 5, kind: output, shape index: {}]  }
   0x1   :  { %11 = vsyncpa [#allocation5], 0  ;;  %s790_s18 = smov [#allocation2]   ;;  %s742_s22 = scalar_lea.hbm %s1005_s1, 1024 }
   0x2   :  { %s19_s19 = sshll.u32 %s790_s18, 4  ;;  %p743_p0 = scmp.ne.s32.totalorder %s1005_s1, %s742_s22  ;;  %s20_s19 = int_to_ptr.vmem [resolvable:$true] %s19_s19 }
   0x3   :  { %p746_p1 = scmp.lt.u32.totalorder %s742_s22, %s1005_s1 }
   0x5   :  { %p748_p2 = pnand %p746_p1, %p743_p0 }
   0x7   :  { %751 = shalt.err (!%p748_p2)
}
   0x8   :  { %s752_s27 = scalar_lea.vmem %s20_s19, 1024  ;;  %p757_p4 = scmp.lt.s32.totalorder %s20_s19, %s20_s19 }
   0x9   :  { %p753_p3 = scmp.ne.s32.totalorder %s20_s19, %s752_s27  ;;  %p758_p5 = scmp.lt.s32.totalorder %s752_s27, %s752_s27 }
   0xb   :  { %p759_p6 = por %p758_p5, %p757_p4 }
   0xd   :  { %p760_p7 = pnand %p759_p6, %p753_p3 }
   0xf   :  { %763 = shalt.err (!%p760_p7)
}
  0x10   :  { %s791_s28 = smov 128   ;;  %s792_s29 = smov 8  }
  0x11   :  { %25 = dma.hbm_to_vmem [thread:$0]  %s1005_s1, 1024, %s20_s19, [#allocation3], %s791_s28, %s791_s28, %s792_s29  }
  0x12   :  { %s793_s7 = smov [#allocation4]   ;;  %s764_s11 = scalar_lea.hbm %s1007_s3, 2048 }
  0x13   :  { %s33_s8 = sshll.u32 %s793_s7, 4  ;;  %p765_p8 = scmp.ne.s32.totalorder %s1007_s3, %s764_s11  ;;  %s34_s8 = int_to_ptr.vmem [resolvable:$true] %s33_s8 }
  0x14   :  { %p768_p9 = scmp.lt.u32.totalorder %s764_s11, %s1007_s3 }
  0x16   :  { %p770_p10 = pnand %p768_p9, %p765_p8 }
  0x18   :  { %773 = shalt.err (!%p770_p10)
}
  0x19   :  { %s774_s16 = scalar_lea.vmem %s34_s8, 2048  ;;  %p779_p12 = scmp.lt.s32.totalorder %s34_s8, %s34_s8 }
  0x1a   :  { %p775_p11 = scmp.ne.s32.totalorder %s34_s8, %s774_s16  ;;  %p780_p13 = scmp.lt.s32.totalorder %s774_s16, %s774_s16 }
  0x1c   :  { %p781_p0 = por %p780_p13, %p779_p12 }
  0x1e   :  { %p782_p1 = pnand %p781_p0, %p775_p11 }
  0x20   :  { %785 = shalt.err (!%p782_p1)
}
  0x21   :  { %39 = dma.hbm_to_vmem [thread:$0]  %s1007_s3, 2048, %s34_s8, [#allocation5], %s791_s28, %s791_s28, %s792_s29  }
  0x22   :  { %786 = dma.done.wait [#allocation3], 1024  }
  0x23   :  { %787 = vsyncadd [#allocation3], 4294966272 }
  0x24   :  { %788 = dma.done.wait [#allocation5], 2048  }
  0x25   :  { %789 = vsyncadd [#allocation5], 4294965248  ;;  %v794_v0 = vmov 0.0|0.0   ;;  %vm795_vm0 = vmmov 0   ;;  %v796_v1 = vmov 0.0   ;;  %v50_v2 = vld [vmem:[#allocation2] sm:$0xff]  ;;  %v58_v39 = vlaneseq }
  0x26   :  { %639 = vmatprep.subr.bf16.mxu0 %v794_v0  ;;  %531 = vmatprep.mubr.msk.f32.mxu0 %vm795_vm0, %v796_v1  ;;  %v51_v3 = vld [vmem:[#allocation2 + $0x8] sm:$0xff]  ;;  %v52_v4 = vld [vmem:[#allocation2 + $0x10] sm:$0xff]  ;;  %v53_v6 = vld [vmem:[#allocation2 + $0x18] sm:$0xff]  ;;  %vm62_vm1 = vcmask 523264  }
  0x27   :  { %651 = vmatprep.subr.bf16.mxu1 %v794_v0  ;;  %566 = vmatprep.mubr.msk.f32.mxu1 %vm795_vm0, %v796_v1  ;;  %v640_v5 = vpack.c.bf16 %v51_v3, %v50_v2  ;;  %v643_v7 = vpack.c.bf16 %v53_v6, %v52_v4  ;;  %v54_v8 = vld [vmem:[#allocation2 + $0x20] sm:$0xff]  ;;  %v55_v9 = vld [vmem:[#allocation2 + $0x28] sm:$0xff]  ;;  %v56_v11 = vld [vmem:[#allocation2 + $0x30] sm:$0xff]  ;;  %v922_v40 = vshrl.u32 %v58_v39, 7 }
  0x28   :  { %v646_v10 = vpack.c.bf16 %v55_v9, %v54_v8  ;;  %v57_v12 = vld [vmem:[#allocation2 + $0x38] sm:$0xff]  ;;  %v49_v14 = vld [vmem:[%s1004_s0] sm:$0xff]  ;;  %v144_v16 = vld [vmem:[%s1006_s2 + $0x8] sm:$0xff] }
  0x29   :  { %641 = vmatpush3.bf16.msra.mxu0 %v640_v5  ;;  %v649_v13 = vpack.c.bf16 %v57_v12, %v56_v11  ;;  %v143_v15 = vld [vmem:[%s1006_s2] sm:$0xff]  ;;  %v145_v18 = vld [vmem:[%s1006_s2 + $0x10] sm:$0xff]  ;;  %v146_v19 = vld [vmem:[%s1006_s2 + $0x18] sm:$0xff]  ;;  %v60_v41 = vsub.s32 0, %v922_v40 }
  0x2a   :  { %642 = vmatprep.subr.bf16.mxu0 %v794_v0  ;;  %v652_v17 = vpack.c.bf16 %v144_v16, %v143_v15  ;;  %v655_v20 = vpack.c.bf16 %v146_v19, %v145_v18  ;;  %v147_v21 = vld [vmem:[%s1006_s2 + $0x20] sm:$0xff]  ;;  %v148_v22 = vld [vmem:[%s1006_s2 + $0x28] sm:$0xff]  ;;  %v149_v24 = vld [vmem:[%s1006_s2 + $0x30] sm:$0xff] }
  0x2b   :  { %v658_v23 = vpack.c.bf16 %v148_v22, %v147_v21  ;;  %v150_v25 = vld [vmem:[%s1006_s2 + $0x38] sm:$0xff]  ;;  %v151_v27 = vld [vmem:[%s1006_s2 + $0x40] sm:$0xff]  ;;  %v152_v28 = vld [vmem:[%s1006_s2 + $0x48] sm:$0xff] }
  0x2c   :  { %653 = vmatpush3.bf16.msra.mxu1 %v652_v17  ;;  %v661_v26 = vpack.c.bf16 %v150_v25, %v149_v24  ;;  %v664_v29 = vpack.c.bf16 %v152_v28, %v151_v27  ;;  %v153_v30 = vld [vmem:[%s1006_s2 + $0x50] sm:$0xff]  ;;  %v154_v31 = vld [vmem:[%s1006_s2 + $0x58] sm:$0xff]  ;;  %v155_v33 = vld [vmem:[%s1006_s2 + $0x60] sm:$0xff] }
  0x2d   :  { %644 = vmatpush3.bf16.msra.mxu0 %v643_v7  ;;  %654 = vmatprep.subr.bf16.mxu1 %v794_v0  ;;  %v667_v32 = vpack.c.bf16 %v154_v31, %v153_v30  ;;  %v156_v34 = vld [vmem:[%s1006_s2 + $0x68] sm:$0xff]  ;;  %v157_v36 = vld [vmem:[%s1006_s2 + $0x70] sm:$0xff]  ;;  %v158_v37 = vld [vmem:[%s1006_s2 + $0x78] sm:$0xff] }
  0x2e   :  { %645 = vmatprep.subr.bf16.mxu0 %v794_v0  ;;  %v670_v35 = vpack.c.bf16 %v156_v34, %v155_v33  ;;  %v673_v38 = vpack.c.bf16 %v158_v37, %v157_v36  ;;  %v928_v42 = vld [vmem:[%s1008_s4] sm:$0xf]  ;;  %v439_v53 = vld [vmem:[%s1006_s2 + $0x88] sm:$0xff]  ;;  %v440_v55 = vld [vmem:[%s1006_s2 + $0x90] sm:$0xff] }
  0x2f   :  { %v61_v43 = vrot.slane %v928_v42, %v60_v41  ;;  %v438_v52 = vld [vmem:[%s1006_s2 + $0x80] sm:$0xff]  ;;  %v441_v56 = vld [vmem:[%s1006_s2 + $0x98] sm:$0xff]  ;;  %v443_v59 = vld [vmem:[%s1006_s2 + $0xa8] sm:$0xff] }
  0x30   :  { %656 = vmatpush3.bf16.msra.mxu1 %v655_v20  ;;  %v676_v54 = vpack.c.bf16 %v439_v53, %v438_v52  ;;  %v679_v57 = vpack.c.bf16 %v441_v56, %v440_v55  ;;  %v442_v58 = vld [vmem:[%s1006_s2 + $0xa0] sm:$0xff]  ;;  %v444_v61 = vld [vmem:[%s1006_s2 + $0xb0] sm:$0xff]  ;;  %v445_v62 = vld [vmem:[%s1006_s2 + $0xb8] sm:$0xff] }
  0x31   :  { %647 = vmatpush3.bf16.msra.mxu0 %v646_v10  ;;  %657 = vmatprep.subr.bf16.mxu1 %v794_v0  ;;  %v682_v60 = vpack.c.bf16 %v443_v59, %v442_v58  ;;  %v685_v63 = vpack.c.bf16 %v445_v62, %v444_v61  ;;  %v447_v2 = vld [vmem:[%s1006_s2 + $0xc8] sm:$0xff]  ;;  %v448_v4 = vld [vmem:[%s1006_s2 + $0xd0] sm:$0xff]  ;;  %v449_v5 = vld [vmem:[%s1006_s2 + $0xd8] sm:$0xff] }
  0x32   :  { %648 = vmatprep.subr.bf16.mxu0 %v794_v0  ;;  %v691_v6 = vpack.c.bf16 %v449_v5, %v448_v4  ;;  %v450_v7 = vld [vmem:[%s1006_s2 + $0xe0] sm:$0xff]  ;;  %v451_v8 = vld [vmem:[%s1006_s2 + $0xe8] sm:$0xff]  ;;  %v452_v10 = vld [vmem:[%s1006_s2 + $0xf0] sm:$0xff] }
  0x33   :  { %v694_v9 = vpack.c.bf16 %v451_v8, %v450_v7  ;;  %v453_v11 = vld [vmem:[%s1006_s2 + $0xf8] sm:$0xff]  ;;  %v339_v24 = vld [vmem:[#allocation4 + $0x8] sm:$0xff] }
  0x34   :  { %659 = vmatpush3.bf16.msra.mxu1 %v658_v23  ;;  %v697_v12 = vpack.c.bf16 %v453_v11, %v452_v10  ;;  %v338_v23 = vld [vmem:[#allocation4] sm:$0xff]  ;;  %v341_v27 = vld [vmem:[#allocation4 + $0x18] sm:$0xff]  ;;  %v343_v30 = vld [vmem:[#allocation4 + $0x28] sm:$0xff] }
  0x35   :  { %650 = vmatpush3.bf16.msra.mxu0 %v649_v13  ;;  %660 = vmatprep.subr.bf16.mxu1 %v794_v0  ;;  %v161_v13 = vsub.s32 1, %v922_v40  ;;  %v700_v25 = vpack.c.bf16 %v339_v24, %v338_v23  ;;  %v345_v33 = vld [vmem:[#allocation4 + $0x38] sm:$0xff]  ;;  %v347_v36 = vld [vmem:[#allocation4 + $0x48] sm:$0xff] }
  0x36   :  { %675 = vmatprep.subr.bf16.mxu0 %v794_v0  ;;  %v349_v39 = vld [vmem:[#allocation4 + $0x58] sm:$0xff] }
  0x38   :  { %532 = vmatmul.mubr.msk.f32.vlgmr.msra.gmra.mrb[0].mxu0 %vm62_vm1, %v49_v14  ;;  %662 = vmatpush3.bf16.msra.mxu1 %v661_v26  ;;  %v162_v14 = vrot.slane %v928_v42, %v161_v13  ;;  %v340_v26 = vld [vmem:[#allocation4 + $0x10] sm:$0xff] }
  0x39   :  { %601 = vmatprep.mubr.msk.f32.mxu0 %vm795_vm0, %v796_v1  ;;  %663 = vmatprep.subr.bf16.mxu1 %v794_v0  ;;  %v703_v28 = vpack.c.bf16 %v341_v27, %v340_v26 }
  0x3a   :  { %677 = vmatpush3.bf16.msra.mxu0 %v676_v54 }
  0x3b   :  { %678 = vmatprep.subr.bf16.mxu0 %v794_v0 }
  0x3c   :  { %665 = vmatpush3.bf16.msra.mxu1 %v664_v29  ;;  %v342_v29 = vld [vmem:[#allocation4 + $0x20] sm:$0xff] }
  0x3d   :  { %666 = vmatprep.subr.bf16.mxu1 %v794_v0  ;;  %v706_v31 = vpack.c.bf16 %v343_v30, %v342_v29 }
  0x3e   :  { %680 = vmatpush3.bf16.msra.mxu0 %v679_v57 }
  0x3f   :  { %681 = vmatprep.subr.bf16.mxu0 %v794_v0 }
  0x40   :  { %668 = vmatpush3.bf16.msra.mxu1 %v667_v32  ;;  %v344_v32 = vld [vmem:[#allocation4 + $0x30] sm:$0xff] }
  0x41   :  { %669 = vmatprep.subr.bf16.mxu1 %v794_v0  ;;  %v709_v34 = vpack.c.bf16 %v345_v33, %v344_v32 }
  0x42   :  { %683 = vmatpush3.bf16.msra.mxu0 %v682_v60 }
  0x43   :  { %684 = vmatprep.subr.bf16.mxu0 %v794_v0 }
  0x44   :  { %671 = vmatpush3.bf16.msra.mxu1 %v670_v35  ;;  %v346_v35 = vld [vmem:[#allocation4 + $0x40] sm:$0xff] }
  0x45   :  { %672 = vmatprep.subr.bf16.mxu1 %v794_v0  ;;  %v712_v37 = vpack.c.bf16 %v347_v36, %v346_v35 }
  0x46   :  { %686 = vmatpush3.bf16.msra.mxu0 %v685_v63 }
  0x47   :  { %687 = vmatprep.subr.bf16.mxu0 %v794_v0 }
  0x48   :  { %674 = vmatpush3.bf16.msra.mxu1 %v673_v38  ;;  %v348_v38 = vld [vmem:[#allocation4 + $0x50] sm:$0xff] }
  0x49   :  { %699 = vmatprep.subr.bf16.mxu1 %v794_v0  ;;  %v715_v41 = vpack.c.bf16 %v349_v39, %v348_v38 }
 0x10b   :  { %v132_v44 = vpop.f32.mrb[0].mxu0 }
 0x10c   :  { %v133_v45 = vadd.f32 %v132_v44, %v61_v43  ;;  %v533_v46 = vpop.f32.mrb[1].mxu0  ;;  %v350_v43 = vld [vmem:[#allocation4 + $0x60] sm:$0xff]  ;;  %v351_v44 = vld [vmem:[#allocation4 + $0x68] sm:$0xff] }
 0x10d   :  { %v352_v46 = vld [vmem:[#allocation4 + $0x70] sm:$0xff] }
 0x10e   :  { %v436_v47 = vmul.f32 -1.442695, %v133_v45 }
 0x110   :  { %730 = vpow2.f32 %v436_v47  ;;  %v353_v47 = vld [vmem:[#allocation4 + $0x78] sm:$0xff] }
 0x11a   :  { %v731_v48 = vpop.eup %730 }
 0x11b   :  { %v139_v49 = vadd.f32 1.0, %v731_v48  ;;  %v721_v48 = vpack.c.bf16 %v353_v47, %v352_v46 }
 0x11d   :  { %732 = vrcp.f32 %v139_v49  ;;  %v259_v49 = vsub.s32 2, %v922_v40 }
 0x127   :  { %v733_v50 = vpop.eup %732 }
 0x128   :  { %v142_v51 = vmul.f32 %v733_v50, %v133_v45  ;;  %v718_v45 = vpack.c.bf16 %v351_v44, %v350_v43  ;;  %v260_v50 = vrot.slane %v928_v42, %v259_v49 }
 0x12a   :  { %567 = vmatmul.mubr.f32.vlgmr.msra.gmra.mrb[0].mxu1 %v142_v51 }
 0x12b   :  { %636 = vmatprep.mubr.msk.f32.mxu1 %vm795_vm0, %v796_v1  ;;  %v446_v1 = vld [vmem:[%s1006_s2 + $0xc0] sm:$0xff]  ;;  %701 = vmatpush3.bf16.msra.mxu1 %v700_v25 }
 0x12c   :  { %v688_v3 = vpack.c.bf16 %v447_v2, %v446_v1  ;;  %702 = vmatprep.subr.bf16.mxu1 %v794_v0 }
 0x12e   :  { %689 = vmatpush3.bf16.msra.mxu0 %v688_v3 }
 0x12f   :  { %690 = vmatprep.subr.bf16.mxu0 %v794_v0  ;;  %704 = vmatpush3.bf16.msra.mxu1 %v703_v28 }
 0x130   :  { %705 = vmatprep.subr.bf16.mxu1 %v794_v0 }
 0x132   :  { %692 = vmatpush3.bf16.msra.mxu0 %v691_v6 }
 0x133   :  { %693 = vmatprep.subr.bf16.mxu0 %v794_v0  ;;  %707 = vmatpush3.bf16.msra.mxu1 %v706_v31 }
 0x134   :  { %708 = vmatprep.subr.bf16.mxu1 %v794_v0 }
 0x136   :  { %695 = vmatpush3.bf16.msra.mxu0 %v694_v9 }
 0x137   :  { %696 = vmatprep.subr.bf16.mxu0 %v794_v0  ;;  %710 = vmatpush3.bf16.msra.mxu1 %v709_v34 }
 0x138   :  { %711 = vmatprep.subr.bf16.mxu1 %v794_v0 }
 0x13a   :  { %698 = vmatpush3.bf16.msra.mxu0 %v697_v12 }
 0x13b   :  { %713 = vmatpush3.bf16.msra.mxu1 %v712_v37 }
 0x13c   :  { %714 = vmatprep.subr.bf16.mxu1 %v794_v0 }
 0x13f   :  { %716 = vmatpush3.bf16.msra.mxu1 %v715_v41 }
 0x140   :  { %717 = vmatprep.subr.bf16.mxu1 %v794_v0 }
 0x143   :  { %719 = vmatpush3.bf16.msra.mxu1 %v718_v45 }
 0x144   :  { %720 = vmatprep.subr.bf16.mxu1 %v794_v0  ;;  %v356_v0 = vsub.s32 3, %v922_v40 }
 0x146   :  { %v357_v59 = vrot.slane %v928_v42, %v356_v0 }
 0x147   :  { %722 = vmatpush3.bf16.msra.mxu1 %v721_v48 }
 0x1fd   :  { %v229_v15 = vpop.f32.mrb[0].mxu1 }
 0x1fe   :  { %v230_v16 = vadd.f32 %v229_v15, %v162_v14  ;;  %v568_v17 = vpop.f32.mrb[1].mxu1 }
 0x200   :  { %v437_v18 = vmul.f32 -1.442695, %v230_v16 }
 0x202   :  { %734 = vpow2.f32 %v437_v18 }
 0x20c   :  { %v735_v19 = vpop.eup %734 }
 0x20d   :  { %v236_v20 = vadd.f32 1.0, %v735_v19 }
 0x20f   :  { %736 = vrcp.f32 %v236_v20 }
 0x219   :  { %v737_v21 = vpop.eup %736 }
 0x21a   :  { %v239_v22 = vmul.f32 %v737_v21, %v230_v16 }
 0x21c   :  { %602 = vmatmul.mubr.f32.vlgmr.msra.gmra.mrb[2].mxu0 %v239_v22 }
 0x2ef   :  { %v327_v51 = vpop.f32.mrb[2].mxu0 }
 0x2f0   :  { %v328_v52 = vadd.f32 %v327_v51, %v260_v50  ;;  %v603_v53 = vpop.f32.mrb[3].mxu0 }
 0x2f2   :  { %v454_v54 = vmul.f32 -1.442695, %v328_v52 }
 0x2f4   :  { %738 = vpow2.f32 %v454_v54 }
 0x2fe   :  { %v739_v55 = vpop.eup %738 }
 0x2ff   :  { %v334_v56 = vadd.f32 1.0, %v739_v55 }
 0x301   :  { %740 = vrcp.f32 %v334_v56 }
 0x30b   :  { %v741_v57 = vpop.eup %740 }
 0x30c   :  { %v337_v58 = vmul.f32 %v741_v57, %v328_v52 }
 0x30e   :  { %637 = vmatmul.mubr.f32.vlgmr.msra.gmra.mrb[2].mxu1 %v337_v58 }
 0x3e1   :  { %v424_v60 = vpop.f32.mrb[2].mxu1 }
 0x3e2   :  { %v425_v61 = vadd.f32 %v424_v60, %v357_v59  ;;  %v638_v62 = vpop.f32.mrb[3].mxu1 }
 0x3e4   :  { %428 = vst [vmem:[%s1009_s5] sm:$0xff] %v425_v61 }
 0x3e5   :  { %433 = vsyncpa [#allocation3], 1 }
 0x3e6   :  { %434 = vsyncpa [#allocation5], 1 }

</bundles_post_ra>
